<compile_context>
chip_gen: v5e
topology: v5e:2x2
jax: 0.10.0
libtpu: 0.0.40
codegen_flags: <defaults>
</compile_context>

<pallas_src>
import jax
import jax.numpy as jnp
from jax.experimental import pallas as pl
from jax.experimental.pallas import tpu as pltpu


def _round_up(v, m):
    return ((v + m - 1) // m) * m


def _cdiv(a, b):
    return (a + b - 1) // b


def _fit_tile(dim, target, align):
    """Pick tile <= ~target (aligned) s.t. padded dim wastes < align per block."""
    t = max(align, min(_round_up(target, align), _round_up(dim, align)))
    nb = _cdiv(dim, t)
    t = _round_up(_cdiv(dim, nb), align)
    return t, nb * t


def _linear_kernel_f32out(x_ref, w_ref, b_ref, o_ref):
    """One (tm, tn) tile, accumulating directly into the f32 output block.

    x_ref: (tm, tk)   activations
    w_ref: (tk, tn)   weight, pre-transposed to (K, N) at parameter-prep time
    b_ref: (1, tn)    bias
    o_ref: (tm, tn)   f32 output block, resident across the K grid axis
    """
    k = pl.program_id(2)
    part = jnp.dot(x_ref[...], w_ref[...], preferred_element_type=jnp.float32)

    @pl.when(k == 0)
    def _():
        o_ref[...] = part + b_ref[...].astype(jnp.float32)

    @pl.when(k > 0)
    def _():
        o_ref[...] += part


def _linear_kernel_acc(x_ref, w_ref, b_ref, o_ref, acc_ref):
    """Scratch-accumulator variant for non-f32 output dtypes."""
    k = pl.program_id(2)
    part = jnp.dot(x_ref[...], w_ref[...], preferred_element_type=jnp.float32)

    @pl.when(k == 0)
    def _():
        acc_ref[...] = part + b_ref[...].astype(jnp.float32)

    @pl.when(k > 0)
    def _():
        acc_ref[...] += part

    @pl.when(k == pl.num_programs(2) - 1)
    def _():
        o_ref[...] = acc_ref[...].astype(o_ref.dtype)


class PallasLinear:
    """torch.nn.Linear forward (out = x @ W.T + b) as a Pallas TPU kernel.

    Weight padding / transpose / dtype-cast happens once in __init__
    (parameter prep); __call__ only pads x and launches the kernel.
    """

    def __init__(self, weight, bias, *, tm=512, tn=512, tk=1024,
                 compute_dtype=None, vmem_budget_bytes=40 * 1024 * 1024):
        N, K = weight.shape                      # torch layout: (OUT, IN)
        assert bias.shape == (N,)
        self.K, self.N = K, N
        self.compute_dtype = compute_dtype

        Kp0 = _round_up(K, 128)
        Np0 = _round_up(N, 128)
        in_bytes = jnp.dtype(compute_dtype).itemsize if compute_dtype is not None \
            else jnp.dtype(weight.dtype).itemsize

        # Fit tiles under the VMEM budget (double-buffered x, W, out blocks).
        tm_t, tn_t, tk_t = max(8, tm), max(128, tn), max(128, tk)
        while True:
            tn_c, Np = _fit_tile(Np0, tn_t, 128)
            tk_c, Kp = _fit_tile(Kp0, tk_t, 128)
            fp = 2 * (tm_t * tk_c * in_bytes + tk_c * tn_c * in_bytes
                      + tm_t * tn_c * 4)
            if fp <= vmem_budget_bytes or (tk_t <= 128 and tn_t <= 128 and tm_t <= 8):
                break
            if tk_t > 128:
                tk_t //= 2
            elif tn_t > 128:
                tn_t //= 2
            else:
                tm_t = max(8, tm_t // 2)

        self.tn, self.tk, self.Np, self.Kp = tn_c, tk_c, Np, Kp
        self.tm_target = max(8, tm_t)

        # v7x megacore: guarantee >=2 blocks along the N ("parallel") axis when
        # possible, using an exact 128-aligned divisor of Np (no extra padding).
        if self.Np // self.tn == 1 and self.Np >= 256:
            for cand in range(self.Np - 128, 0, -128):
                if self.Np % cand == 0:
                    self.tn = cand
                    break

        # ---- One-time parameter prep (off the hot path) ----
        w_t = weight.T                            # (K, N)
        if self.Kp != K or self.Np != N:
            w_t = jnp.pad(w_t, ((0, self.Kp - K), (0, self.Np - N)))
        if compute_dtype is not None:
            w_t = w_t.astype(compute_dtype)
        b_p = bias if self.Np == N else jnp.pad(bias, (0, self.Np - N))
        self.w_p = jax.block_until_ready(w_t)
        self.b_p = jax.block_until_ready(b_p.reshape(1, self.Np))

    def __call__(self, x):
        M, K = x.shape
        assert K == self.K, "x last dim must equal in_features"

        Mp0 = _round_up(M, 8)
        tm, Mp = _fit_tile(Mp0, self.tm_target, 8)

        x_p = x
        if Mp != M or self.Kp != K:
            x_p = jnp.pad(x, ((0, Mp - M), (0, self.Kp - K)))
        if self.compute_dtype is not None and x_p.dtype != self.compute_dtype:
            x_p = x_p.astype(self.compute_dtype)

        out_dtype = jnp.float32 if x.dtype == jnp.float32 else x.dtype
        grid = (Mp // tm, self.Np // self.tn, self.Kp // self.tk)

        # Pipelined VMEM footprint -> explicit vmem limit (portable v5e/v6e/v7x).
        fp = 2 * (tm * self.tk * x_p.dtype.itemsize
                  + self.tk * self.tn * self.w_p.dtype.itemsize
                  + tm * self.tn * jnp.dtype(out_dtype).itemsize)
        if out_dtype != jnp.float32:
            fp += tm * self.tn * 4                # scratch accumulator
        vmem_limit = int(min(64 * 2**20, max(16 * 2**20, fp + 8 * 2**20)))

        common = dict(
            out_shape=jax.ShapeDtypeStruct((Mp, self.Np), out_dtype),
            grid=grid,
            in_specs=[
                pl.BlockSpec((tm, self.tk), lambda i, j, k: (i, k)),        # x
                pl.BlockSpec((self.tk, self.tn), lambda i, j, k: (k, j)),   # W (K,N)
                pl.BlockSpec((1, self.tn), lambda i, j, k: (0, j)),         # bias
            ],
            out_specs=pl.BlockSpec((tm, self.tn), lambda i, j, k: (i, j)),
            compiler_params=pltpu.CompilerParams(
                dimension_semantics=("parallel", "parallel", "arbitrary"),
                vmem_limit_bytes=vmem_limit,
            ),
        )

        if out_dtype == jnp.float32:
            out_p = pl.pallas_call(_linear_kernel_f32out, **common)(
                x_p, self.w_p, self.b_p)
        else:
            out_p = pl.pallas_call(
                _linear_kernel_acc,
                scratch_shapes=[pltpu.VMEM((tm, self.tn), jnp.float32)],
                **common)(x_p, self.w_p, self.b_p)

        if Mp != M or self.Np != self.N:
            out_p = out_p[:M, :self.N]
        return out_p


if __name__ == "__main__":
    key = jax.random.PRNGKey(0)
    keys = jax.random.split(key, 9)

    # --- 1) Small shapes consistent with nn.Linear(input, output) -----------
    B, IN, OUT = 8, 32, 16
    bound = 1.0 / jnp.sqrt(jnp.float32(IN))
    x = jax.random.normal(keys[0], (B, IN), dtype=jnp.float32)
    w = jax.random.uniform(keys[1], (OUT, IN), minval=-bound, maxval=bound,
                           dtype=jnp.float32)
    b = jax.random.uniform(keys[2], (OUT,), minval=-bound, maxval=bound,
                           dtype=jnp.float32)
    lin = PallasLinear(w, b)
    out = jax.block_until_ready(lin(x))
    ref = x @ w.T + b
    assert out.shape == (B, OUT)
    assert jnp.allclose(out, ref, atol=1e-5, rtol=1e-5)

    # --- 2) Unaligned K/N, multi-step K accumulation (f32 direct-acc path) --
    B2, IN2, OUT2 = 16, 640, 384
    bound2 = 1.0 / jnp.sqrt(jnp.float32(IN2))
    x2 = jax.random.normal(keys[3], (B2, IN2), dtype=jnp.float32)
    w2 = jax.random.uniform(keys[4], (OUT2, IN2), minval=-bound2, maxval=bound2,
                            dtype=jnp.float32)
    b2 = jax.random.uniform(keys[5], (OUT2,), minval=-bound2, maxval=bound2,
                            dtype=jnp.float32)
    lin2 = PallasLinear(w2, b2, tk=256)           # force K grid > 1
    out2 = jax.block_until_ready(lin2(x2))
    ref2 = x2 @ w2.T + b2
    assert out2.shape == (B2, OUT2)
    assert jnp.allclose(out2, ref2, atol=1e-4, rtol=1e-4)

    # --- 3) Opt-in bf16 MXU path (f32 accumulate, relaxed tolerance) --------
    B3, IN3, OUT3 = 64, 512, 256
    bound3 = 1.0 / jnp.sqrt(jnp.float32(IN3))
    x3 = jax.random.normal(keys[6], (B3, IN3), dtype=jnp.float32)
    w3 = jax.random.uniform(keys[7], (OUT3, IN3), minval=-bound3, maxval=bound3,
                            dtype=jnp.float32)
    b3 = jax.random.uniform(keys[8], (OUT3,), minval=-bound3, maxval=bound3,
                            dtype=jnp.float32)
    lin3 = PallasLinear(w3, b3, compute_dtype=jnp.bfloat16)
    out3 = jax.block_until_ready(lin3(x3))
    ref3 = x3 @ w3.T + b3
    assert out3.shape == (B3, OUT3)
    assert jnp.allclose(out3, ref3, atol=5e-2, rtol=5e-2)

    print("KERNEL_OK")
</pallas_src>

<mosaic_0001>
module attributes {stable_mosaic.version = 11 : i64} {
  func.func @_linear_kernel_f32out(%arg0: i32, %arg1: i32, %arg2: i32, %arg3: memref<8x128xf32, #tpu.memory_space<vmem>>, %arg4: memref<128x128xf32, #tpu.memory_space<vmem>>, %arg5: memref<1x128xf32, #tpu.memory_space<vmem>>, %arg6: memref<8x128xf32, #tpu.memory_space<vmem>>) attributes {dimension_semantics = [#tpu.dimension_semantics<parallel>, #tpu.dimension_semantics<parallel>, #tpu.dimension_semantics<arbitrary>], iteration_bounds = array<i64: 1, 1, 1>, scalar_prefetch = 0 : i64, scratch_operands = 0 : i64, tpu.core_type = #tpu.core_type<tc>, window_params = [{transform_indices = @transform_0, window_bounds = array<i64: 8, 128>}, {transform_indices = @transform_1, window_bounds = array<i64: 128, 128>}, {transform_indices = @transform_2, window_bounds = array<i64: 1, 128>}, {transform_indices = @transform_3, window_bounds = array<i64: 8, 128>}]} {
    %c0 = arith.constant 0 : index
    %c0_0 = arith.constant 0 : index
    %0 = vector.load %arg3[%c0, %c0_0] : memref<8x128xf32, #tpu.memory_space<vmem>>, vector<8x128xf32>
    %c0_1 = arith.constant 0 : index
    %c0_2 = arith.constant 0 : index
    %1 = vector.load %arg4[%c0_1, %c0_2] : memref<128x128xf32, #tpu.memory_space<vmem>>, vector<128x128xf32>
    %cst = arith.constant dense<0.000000e+00> : vector<8x128xf32>
    %2 = tpu.matmul %0, %1, %cst {dimension_numbers = #tpu.dot_dimension_numbers<[1], [0], [0], [1], [0, 0, 1, 1], [], []>} : vector<8x128xf32>, vector<128x128xf32>, vector<8x128xf32> -> vector<8x128xf32>
    %c0_i32 = arith.constant 0 : i32
    %3 = arith.cmpi eq, %arg2, %c0_i32 : i32
    %4 = arith.extui %3 : i1 to i32
    %c0_i32_3 = arith.constant 0 : i32
    %5 = arith.cmpi ne, %4, %c0_i32_3 : i32
    scf.if %5 {
      %c0_6 = arith.constant 0 : index
      %c0_7 = arith.constant 0 : index
      %9 = vector.load %arg5[%c0_6, %c0_7] : memref<1x128xf32, #tpu.memory_space<vmem>>, vector<1x128xf32>
      %10 = vector.broadcast %9 : vector<1x128xf32> to vector<8x128xf32>
      %11 = arith.addf %2, %10 : vector<8x128xf32>
      %c0_8 = arith.constant 0 : index
      %c0_9 = arith.constant 0 : index
      %12 = vector.load %arg6[%c0_8, %c0_9] : memref<8x128xf32, #tpu.memory_space<vmem>>, vector<8x128xf32>
      tpu.vector_store %arg6[%c0_8, %c0_9], %11 {strides = array<i32>} : memref<8x128xf32, #tpu.memory_space<vmem>>, vector<8x128xf32>,
    } else {
    }
    %c0_i32_4 = arith.constant 0 : i32
    %6 = arith.cmpi sgt, %arg2, %c0_i32_4 : i32
    %7 = arith.extui %6 : i1 to i32
    %c0_i32_5 = arith.constant 0 : i32
    %8 = arith.cmpi ne, %7, %c0_i32_5 : i32
    scf.if %8 {
      %c0_6 = arith.constant 0 : index
      %c0_7 = arith.constant 0 : index
      %9 = vector.load %arg6[%c0_6, %c0_7] : memref<8x128xf32, #tpu.memory_space<vmem>>, vector<8x128xf32>
      %10 = arith.addf %9, %2 : vector<8x128xf32>
      %c0_8 = arith.constant 0 : index
      %c0_9 = arith.constant 0 : index
      %11 = vector.load %arg6[%c0_8, %c0_9] : memref<8x128xf32, #tpu.memory_space<vmem>>, vector<8x128xf32>
      tpu.vector_store %arg6[%c0_8, %c0_9], %10 {strides = array<i32>} : memref<8x128xf32, #tpu.memory_space<vmem>>, vector<8x128xf32>,
    } else {
    }
    return
  }
  func.func @transform_0(%arg0: i32, %arg1: i32, %arg2: i32) -> (i32, i32) {
    %c0_i32 = arith.constant 0 : i32
    return %arg0, %arg2 : i32, i32
  }
  func.func @transform_1(%arg0: i32, %arg1: i32, %arg2: i32) -> (i32, i32) {
    %c0_i32 = arith.constant 0 : i32
    return %arg2, %arg1 : i32, i32
  }
  func.func @transform_2(%arg0: i32, %arg1: i32, %arg2: i32) -> (i32, i32) {
    %c0_i32 = arith.constant 0 : i32
    %c0_i32_0 = arith.constant 0 : i32
    return %c0_i32, %arg1 : i32, i32
  }
  func.func @transform_3(%arg0: i32, %arg1: i32, %arg2: i32) -> (i32, i32) {
    %c0_i32 = arith.constant 0 : i32
    return %arg0, %arg1 : i32, i32
  }
}

</mosaic_0001>

<bundles_post_ra>
// kernel: tpu_custom_call.1
= control target key start
LH: loop header
LB: loop body
LE: loop exit
PB: predicated region body
PF: predicated region fallthrough
CT: control target
= control target key end

     0   :  { %8 = vsyncpa [#allocation3], 0  ;;  %s238_s0 = inlined_call_operand.hbm [shape: f32[8,128], index: 0, kind: input, shape index: {}]   ;;  %s239_s1 = inlined_call_operand.hbm [shape: f32[128,128], index: 1, kind: input, shape index: {}]   ;;  %s240_s2 = inlined_call_operand.vmem [shape: f32[1,128], index: 2, kind: input, shape index: {}]   ;;  %s241_s3 = inlined_call_operand.hbm [shape: f32[8,128], index: 3, kind: output, shape index: {}]  }
   0x1   :  { %9 = vsyncpa [#allocation6], 0 }
   0x2   :  { %10 = vsyncpa [#allocation4], 0  ;;  %s16_s14 = sshll.u32 %s238_s0, 4  ;;  %s201_s15 = smov [#allocation2]   ;;  %s17_s14 = int_to_ptr.hbm [resolvable:$true] %s16_s14 }
   0x3   :  { %s18_s16 = sshll.u32 %s201_s15, 4  ;;  %s26_s19 = sshll.u32 %s239_s1, 4  ;;  %s19_s16 = int_to_ptr.vmem [resolvable:$true] %s18_s16  ;;  %s27_s19 = int_to_ptr.hbm [resolvable:$true] %s26_s19 }
   0x4   :  { %21 = dma.hbm_to_vmem [thread:$0]  %s17_s14, 128, %s19_s16, [#allocation3]  }
   0x5   :  { %s202_s20 = smov [#allocation5]   ;;  %s203_s22 = smov 128  }
   0x6   :  { %s28_s21 = sshll.u32 %s202_s20, 4  ;;  %s204_s23 = smov 8   ;;  %s29_s21 = int_to_ptr.vmem [resolvable:$true] %s28_s21 }
   0x7   :  { %34 = dma.hbm_to_vmem [thread:$0]  %s27_s19, 2048, %s29_s21, [#allocation6], %s203_s22, %s203_s22, %s204_s23  }
   0x8   :  { %195 = dma.done.wait [#allocation3], 128  }
   0x9   :  { %196 = vsyncadd [#allocation3], 4294967168 }
   0xa   :  { %197 = dma.done.wait [#allocation6], 2048  }
   0xb   :  { %198 = vsyncadd [#allocation6], 4294965248  ;;  %v61_v0 = vld [vmem:[#allocation5 + $0x78] sm:$0xff]  ;;  %v60_v1 = vld [vmem:[#allocation5 + $0x70] sm:$0xff]  ;;  %s205_s24 = smov [#allocation7]   ;;  %s106_s28 = sshll.u32 %s241_s3, 4  ;;  %s107_s28 = int_to_ptr.hbm [resolvable:$true] %s106_s28 }
   0xc   :  { %62 = vmatpush.msra.mxu0 %v61_v0  ;;  %v59_v2 = vld [vmem:[#allocation5 + $0x68] sm:$0xff]  ;;  %v58_v3 = vld [vmem:[#allocation5 + $0x60] sm:$0xff]  ;;  %v57_v4 = vld [vmem:[#allocation5 + $0x58] sm:$0xff]  ;;  %s104_s25 = sshll.u32 %s205_s24, 4  ;;  %s105_s25 = int_to_ptr.vmem [resolvable:$true] %s104_s25 }
   0xd   :  { %v56_v5 = vld [vmem:[#allocation5 + $0x50] sm:$0xff]  ;;  %v55_v6 = vld [vmem:[#allocation5 + $0x48] sm:$0xff]  ;;  %v54_v7 = vld [vmem:[#allocation5 + $0x40] sm:$0xff] }
   0xe   :  { %63 = vmatpush.msra.mxu0 %v60_v1  ;;  %v53_v8 = vld [vmem:[#allocation5 + $0x38] sm:$0xff]  ;;  %v52_v9 = vld [vmem:[#allocation5 + $0x30] sm:$0xff]  ;;  %v51_v10 = vld [vmem:[#allocation5 + $0x28] sm:$0xff] }
   0xf   :  { %v50_v11 = vld [vmem:[#allocation5 + $0x20] sm:$0xff]  ;;  %v49_v12 = vld [vmem:[#allocation5 + $0x18] sm:$0xff]  ;;  %v48_v13 = vld [vmem:[#allocation5 + $0x10] sm:$0xff] }
  0x10   :  { %64 = vmatpush.msra.mxu0 %v59_v2  ;;  %v47_v14 = vld [vmem:[#allocation5 + $0x8] sm:$0xff]  ;;  %v46_v15 = vld [vmem:[#allocation5] sm:$0xff]  ;;  %v45_v16 = vld [vmem:[#allocation2] sm:$0xff] }
  0x11   :  { %v122_v17 = vld [vmem:[%s240_s2] ss:$0 sm:$0xff] }
  0x12   :  { %65 = vmatpush.msra.mxu0 %v58_v3 }
  0x14   :  { %66 = vmatpush.msra.mxu0 %v57_v4 }
  0x16   :  { %67 = vmatpush.msra.mxu0 %v56_v5 }
  0x18   :  { %68 = vmatpush.msra.mxu0 %v55_v6 }
  0x1a   :  { %69 = vmatpush.msra.mxu0 %v54_v7 }
  0x1c   :  { %70 = vmatpush.msra.mxu0 %v53_v8 }
  0x1e   :  { %71 = vmatpush.msra.mxu0 %v52_v9 }
  0x20   :  { %72 = vmatpush.msra.mxu0 %v51_v10 }
  0x22   :  { %73 = vmatpush.msra.mxu0 %v50_v11 }
  0x24   :  { %74 = vmatpush.msra.mxu0 %v49_v12 }
  0x26   :  { %75 = vmatpush.msra.mxu0 %v48_v13 }
  0x28   :  { %76 = vmatpush.msra.mxu0 %v47_v14 }
  0x2a   :  { %77 = vmatpush.msra.mxu0 %v46_v15 }
  0x2b   :  { %78 = vmatmul.f32.vlgmr.msra.gmra.mxu0 %v45_v16 }
  0xa8   :  { %v79_v18 = vpop.f32.mrf.mxu0 }
  0xa9   :  { %v90_v19 = vadd.f32 %v122_v17, %v79_v18 }
  0xab   :  { %91 = vst [vmem:[#allocation7] sm:$0xff] %v90_v19 }
  0xac   :  { %109 = dma.vmem_to_hbm [thread:$0]  %s105_s25, 128, %s107_s28, [#allocation4]  }
  0xad   :  { %199 = dma.done.wait [#allocation4], 128  }
  0xae   :  { %200 = vsyncadd [#allocation4], 4294967168 }
  0xaf   :  { %114 = vsyncpa [#allocation3], 1 }
  0xb0   :  { %115 = vsyncpa [#allocation6], 1 }
  0xb1   :  { %116 = vsyncpa [#allocation4], 1 }

</bundles_post_ra>
